<compile_context>
chip_gen: v5e
topology: v5e:2x2
jax: 0.10.0
libtpu: 0.0.40
codegen_flags: <defaults>
</compile_context>

<pallas_src>
import functools

import jax
import jax.numpy as jnp
from jax.experimental import pallas as pl
from jax.experimental.pallas import tpu as pltpu

_MiB = 1024 * 1024


def _device_vmem_bytes():
    """Physical VMEM per TensorCore; conservative 64 MiB (v7x) if unknown."""
    try:
        return int(pltpu.get_tpu_info().vmem_capacity_bytes)
    except Exception:  # hardware query only -- cannot mask kernel errors
        return 64 * _MiB


def _clamp_vmem_limit(est_bytes, cap_bytes):
    limit = max(32 * _MiB, int(est_bytes) + 8 * _MiB)
    return int(min(cap_bytes - 2 * _MiB, limit))


def _pick_divisor(n, target):
    """Largest divisor of n that is <= target and (a multiple of 8 or n)."""
    for d in range(min(n, target), 0, -1):
        if n % d == 0 and (d == n or d % 8 == 0):
            return d
    return n


# ----------------------------- kernel bodies ---------------------------------
def _ln_mod_qkv_kernel(x_ref, mod_ref, wq_ref, wk_ref, wv_ref,
                       bq_ref, bk_ref, bv_ref,
                       q_ref, k_ref, v_ref, *, num_heads, eps=1e-6):
    """q = mod(LN(x)) @ Wq + bq (token-major); k, v written head-major."""
    x = x_ref[0]                               # (TN, D) f32
    D = x.shape[-1]
    Dh = D // num_heads
    mod = mod_ref[0]                           # (6, D)  f32
    shift, scale = mod[0:1, :], mod[1:2, :]

    mu = jnp.mean(x, axis=-1, keepdims=True)
    var = jnp.mean(x * x, axis=-1, keepdims=True) - mu * mu   # one-pass variance
    h = (x - mu) * jax.lax.rsqrt(var + eps)
    h = (h * (1.0 + scale) + shift).astype(wq_ref.dtype)      # single bf16 cast

    q = jnp.dot(h, wq_ref[...], preferred_element_type=jnp.float32) + bq_ref[...]
    q_ref[0] = q.astype(q_ref.dtype)           # lane-dense (TN, D) store

    k = (jnp.dot(h, wk_ref[...], preferred_element_type=jnp.float32)
         + bk_ref[...]).astype(k_ref.dtype)
    v = (jnp.dot(h, wv_ref[...], preferred_element_type=jnp.float32)
         + bv_ref[...]).astype(v_ref.dtype)
    # Head-major layout for K/V so the attention kernel never relays them out.
    for hd in range(num_heads):
        k_ref[0, hd] = k[:, hd * Dh:(hd + 1) * Dh]
        v_ref[0, hd] = v[:, hd * Dh:(hd + 1) * Dh]


def _flash_attn_kernel(q_ref, k_ref, v_ref, o_ref, acc_scr, m_scr, l_scr,
                       *, num_heads, kv_chunk):
    """Online-softmax attention; K/V full-sequence resident per batch.

    grid = (B, q_tiles); KV chunks are iterated inside the kernel.
    Softmax scale is pre-folded into W_q, so no scaling here.
    """
    H = num_heads
    TQ, D = q_ref.shape[1], q_ref.shape[2]
    Dh = D // H
    N = k_ref.shape[2]

    q = q_ref[0]                                               # (TQ, D) bf16
    qh = jnp.stack([q[:, h * Dh:(h + 1) * Dh] for h in range(H)], axis=0)  # (H,TQ,Dh)

    acc_scr[...] = jnp.zeros(acc_scr.shape, jnp.float32)
    m_scr[...] = jnp.full(m_scr.shape, -jnp.inf, jnp.float32)
    l_scr[...] = jnp.zeros(l_scr.shape, jnp.float32)

    def body(j, carry):
        off = pl.multiple_of(j * kv_chunk, kv_chunk)
        k = k_ref[0, :, pl.ds(off, kv_chunk), :]               # (H, TK, Dh) bf16
        v = v_ref[0, :, pl.ds(off, kv_chunk), :]               # (H, TK, Dh) bf16
        s = jax.lax.dot_general(qh, k, (((2,), (2,)), ((0,), (0,))),
                                preferred_element_type=jnp.float32)   # (H,TQ,TK)
        m_prev = m_scr[...]
        m_new = jnp.maximum(m_prev, jnp.max(s, axis=-1, keepdims=True))
        alpha = jnp.exp(m_prev - m_new)
        p = jnp.exp(s - m_new)
        l_scr[...] = alpha * l_scr[...] + jnp.sum(p, axis=-1, keepdims=True)
        pv = jax.lax.dot_general(p.astype(v.dtype), v,
                                 (((2,), (1,)), ((0,), (0,))),
                                 preferred_element_type=jnp.float32)  # (H,TQ,Dh)
        acc_scr[...] = alpha * acc_scr[...] + pv
        m_scr[...] = m_new
        return carry

    jax.lax.fori_loop(0, N // kv_chunk, body, 0)

    inv_l = pl.reciprocal(l_scr[...], approx=True)             # EUP slot
    out = acc_scr[...] * inv_l                                 # (H, TQ, Dh) f32
    # Merge heads into a lane-dense (TQ, D) output block.
    for h in range(H):
        o_ref[0, :, h * Dh:(h + 1) * Dh] = out[h].astype(o_ref.dtype)


def _proj_res_mlp_kernel(x_ref, a_ref, mod_ref, wp_ref, bp_ref,
                         w1_ref, b1_ref, w2_ref, b2_ref, o_ref,
                         x1_scr, h_scr, acc_scr, *, eps=1e-6):
    """x1 = x + gate_msa*(attn @ Wp + bp); out = x1 + gate_mlp*MLP(mod(LN(x1))).

    grid = (B, token_tiles, Hm_tiles); the MLP hidden dim is the reduction axis.
    """
    j = pl.program_id(2)

    @pl.when(j == 0)
    def _():
        x = x_ref[0]                                           # (TN, D) f32
        mod = mod_ref[0]
        gate_msa, shift_mlp, scale_mlp = mod[2:3, :], mod[3:4, :], mod[4:5, :]
        attn = jnp.dot(a_ref[0], wp_ref[...],
                       preferred_element_type=jnp.float32) + bp_ref[...]
        x1 = x + gate_msa * attn
        x1_scr[...] = x1
        mu = jnp.mean(x1, axis=-1, keepdims=True)
        var = jnp.mean(x1 * x1, axis=-1, keepdims=True) - mu * mu
        h = (x1 - mu) * jax.lax.rsqrt(var + eps)
        h_scr[...] = (h * (1.0 + scale_mlp) + shift_mlp).astype(h_scr.dtype)
        acc_scr[...] = jnp.zeros(acc_scr.shape, jnp.float32)

    # Per-Hm-tile: fc1 slice -> GELU(tanh) -> fc2 slice, accumulated in f32.
    ff = jnp.dot(h_scr[...], w1_ref[...],
                 preferred_element_type=jnp.float32) + b1_ref[...]
    ff = jax.nn.gelu(ff, approximate=True)
    acc_scr[...] += jnp.dot(ff.astype(w2_ref.dtype), w2_ref[...],
                            preferred_element_type=jnp.float32)

    @pl.when(j == pl.num_programs(2) - 1)
    def _():
        gate_mlp = mod_ref[0][5:6, :]
        o_ref[0] = (x1_scr[...] + gate_mlp * (acc_scr[...] + b2_ref[...])
                    ).astype(o_ref.dtype)


# ------------------------------ host wrapper ----------------------------------
def dit_block(x, c, params, *, num_heads):
    B, N, D = x.shape
    H = num_heads
    assert D % H == 0, "hidden_size must be divisible by num_heads"
    Dh = D // H
    Hm = params["w_fc1"].shape[1]
    f32, bf16 = jnp.float32, jnp.bfloat16

    cap = _device_vmem_bytes()
    big_vmem = cap >= 96 * _MiB

    # --- tile selection (divisor-based: no hard shape asserts) ---------------
    TN1 = _pick_divisor(N, 512 if big_vmem else 256)   # kernel 1 token tile
    TQ = _pick_divisor(N, 256)                         # kernel 2 query tile
    TK = _pick_divisor(N, 512 if big_vmem else 256)    # kernel 2 in-kernel KV chunk
    TN3 = _pick_divisor(N, 256)                        # kernel 3 token tile

    def _k3_footprint(th):
        wbytes = 2 * (D * D * 2 + 2 * D * th * 2 + (2 * D + th) * 4)
        blocks = 2 * (TN3 * D * 4 + TN3 * D * 2 + 6 * D * 4 + TN3 * D * 4)
        scratch = TN3 * D * (4 + 2 + 4)
        interm = 3 * TN3 * th * 4          # (TN, TH) f32 GELU intermediate etc.
        return wbytes + blocks + scratch + interm

    budget = int(0.75 * cap)
    if _k3_footprint(Hm) <= budget:
        TH = Hm                             # weights fully resident (v5e/v6e)
    else:                                   # v7x: stream fc1/fc2 in Hm tiles
        cands = sorted((d for d in range(128, Hm, 128) if Hm % d == 0),
                       reverse=True)
        TH = Hm
        for d in cands:
            TH = d
            if _k3_footprint(d) <= budget:
                break

    # --- adaLN modulation in plain XLA (tiny GEMM; keeps (D, 6D) out of VMEM)
    silu_c = c * jax.nn.sigmoid(c)
    mod = (silu_c @ params["w_ada"] + params["b_ada"]).astype(f32).reshape(B, 6, D)

    # --- weight prep: split QKV; fold softmax scale into W_q/b_q in f32 ------
    scale = Dh ** -0.5
    w_qkv = params["w_qkv"].astype(f32)
    b_qkv = params["b_qkv"].astype(f32)
    w_q = (w_qkv[:, :D] * scale).astype(bf16)
    w_k = w_qkv[:, D:2 * D].astype(bf16)
    w_v = w_qkv[:, 2 * D:].astype(bf16)
    b_q = (b_qkv[:D] * scale).reshape(1, D).astype(f32)
    b_k = b_qkv[D:2 * D].reshape(1, D).astype(f32)
    b_v = b_qkv[2 * D:].reshape(1, D).astype(f32)

    w_proj = params["w_proj"].astype(bf16)
    b_proj = params["b_proj"].reshape(1, D).astype(f32)
    w_fc1 = params["w_fc1"].astype(bf16)
    b_fc1 = params["b_fc1"].reshape(1, Hm).astype(f32)
    w_fc2 = params["w_fc2"].astype(bf16)
    b_fc2 = params["b_fc2"].reshape(1, D).astype(f32)

    # ---- Kernel 1: modulate(LN(x)) -> q (B,N,D), k/v (B,H,N,Dh) --------------
    k1_vmem = (2 * (3 * D * D * 2 + 3 * D * 4)
               + 2 * (TN1 * D * 4 + 6 * D * 4 + 3 * TN1 * D * 2)
               + 6 * TN1 * D * 4)
    k1_cost = pl.CostEstimate(
        flops=2 * B * N * 3 * D * D,
        transcendentals=B * N,
        bytes_accessed=B * N * D * 4 + 3 * B * N * D * 2 + 3 * D * D * 2
                       + B * 6 * D * 4)
    # TODO(synk): for very large D, additionally tile w_q/w_k/w_v over their
    # output dim instead of keeping all three fully VMEM-resident.
    q, k, v = pl.pallas_call(
        functools.partial(_ln_mod_qkv_kernel, num_heads=H),
        out_shape=(
            jax.ShapeDtypeStruct((B, N, D), bf16),        # q (token-major)
            jax.ShapeDtypeStruct((B, H, N, Dh), bf16),    # k (head-major)
            jax.ShapeDtypeStruct((B, H, N, Dh), bf16),    # v (head-major)
        ),
        grid_spec=pltpu.PrefetchScalarGridSpec(
            num_scalar_prefetch=0,
            grid=(B, N // TN1),
            in_specs=[
                pl.BlockSpec((1, TN1, D), lambda b, t: (b, t, 0)),   # x
                pl.BlockSpec((1, 6, D), lambda b, t: (b, 0, 0)),     # modulation
                pl.BlockSpec((D, D), lambda b, t: (0, 0)),           # w_q
                pl.BlockSpec((D, D), lambda b, t: (0, 0)),           # w_k
                pl.BlockSpec((D, D), lambda b, t: (0, 0)),           # w_v
                pl.BlockSpec((1, D), lambda b, t: (0, 0)),           # b_q
                pl.BlockSpec((1, D), lambda b, t: (0, 0)),           # b_k
                pl.BlockSpec((1, D), lambda b, t: (0, 0)),           # b_v
            ],
            out_specs=[
                pl.BlockSpec((1, TN1, D), lambda b, t: (b, t, 0)),
                pl.BlockSpec((1, H, TN1, Dh), lambda b, t: (b, 0, t, 0)),
                pl.BlockSpec((1, H, TN1, Dh), lambda b, t: (b, 0, t, 0)),
            ],
        ),
        compiler_params=pltpu.CompilerParams(
            dimension_semantics=("parallel", "parallel"),
            vmem_limit_bytes=_clamp_vmem_limit(k1_vmem, cap)),
        cost_estimate=k1_cost,
    )(x, mod, w_q, w_k, w_v, b_q, b_k, b_v)

    # ---- Kernel 2: attention, K/V resident per batch, output (B,N,D) ---------
    # TODO(synk): for extremely long sequences where full-N K/V no longer fit
    # VMEM, add a KV grid axis (or page the KV chunks with manual DMA).
    k2_vmem = (2 * 2 * TQ * D * 2                 # q + out blocks (double-buffered)
               + 2 * 2 * H * N * Dh * 2           # resident K and V (double-buffered)
               + H * TQ * Dh * 4 + 2 * H * TQ * 128 * 4
               + 4 * H * TQ * TK * 4)
    k2_cost = pl.CostEstimate(
        flops=4 * B * N * N * D,
        transcendentals=B * H * N * N,
        bytes_accessed=4 * B * N * D * 2)
    attn = pl.pallas_call(
        functools.partial(_flash_attn_kernel, num_heads=H, kv_chunk=TK),
        out_shape=jax.ShapeDtypeStruct((B, N, D), bf16),
        grid_spec=pltpu.PrefetchScalarGridSpec(
            num_scalar_prefetch=0,
            grid=(B, N // TQ),
            in_specs=[
                pl.BlockSpec((1, TQ, D), lambda b, t: (b, t, 0)),          # q
                pl.BlockSpec((1, H, N, Dh), lambda b, t: (b, 0, 0, 0)),    # k (resident)
                pl.BlockSpec((1, H, N, Dh), lambda b, t: (b, 0, 0, 0)),    # v (resident)
            ],
            out_specs=pl.BlockSpec((1, TQ, D), lambda b, t: (b, t, 0)),
            scratch_shapes=[
                pltpu.VMEM((H, TQ, Dh), jnp.float32),   # running numerator
                pltpu.VMEM((H, TQ, 1), jnp.float32),    # running max m
                pltpu.VMEM((H, TQ, 1), jnp.float32),    # running denom l
            ],
        ),
        compiler_params=pltpu.CompilerParams(
            dimension_semantics=("parallel", "parallel"),
            vmem_limit_bytes=_clamp_vmem_limit(k2_vmem, cap)),
        cost_estimate=k2_cost,
    )(q, k, v)

    # ---- Kernel 3: out-proj + gated residual + LN + modulate + Hm-tiled MLP --
    n_t3 = N // TN3
    n_j = Hm // TH
    fc_bytes = 2 * D * Hm * 2 * (1 if n_j == 1 else B * n_t3)
    k3_vmem = _k3_footprint(TH)
    k3_cost = pl.CostEstimate(
        flops=2 * B * N * D * D + 4 * B * N * D * Hm,
        transcendentals=B * N * Hm,
        bytes_accessed=B * N * D * (4 + 2 + 4) + B * 6 * D * 4 + D * D * 2
                       + fc_bytes)
    out = pl.pallas_call(
        _proj_res_mlp_kernel,
        out_shape=jax.ShapeDtypeStruct((B, N, D), x.dtype),
        grid_spec=pltpu.PrefetchScalarGridSpec(
            num_scalar_prefetch=0,
            grid=(B, n_t3, n_j),
            in_specs=[
                pl.BlockSpec((1, TN3, D), lambda b, t, j: (b, t, 0)),   # x
                pl.BlockSpec((1, TN3, D), lambda b, t, j: (b, t, 0)),   # attn
                pl.BlockSpec((1, 6, D), lambda b, t, j: (b, 0, 0)),     # modulation
                pl.BlockSpec((D, D), lambda b, t, j: (0, 0)),           # w_proj
                pl.BlockSpec((1, D), lambda b, t, j: (0, 0)),           # b_proj
                pl.BlockSpec((D, TH), lambda b, t, j: (0, j)),          # w_fc1 tile
                pl.BlockSpec((1, TH), lambda b, t, j: (0, j)),          # b_fc1 tile
                pl.BlockSpec((TH, D), lambda b, t, j: (j, 0)),          # w_fc2 tile
                pl.BlockSpec((1, D), lambda b, t, j: (0, 0)),           # b_fc2
            ],
            out_specs=pl.BlockSpec((1, TN3, D), lambda b, t, j: (b, t, 0)),
            scratch_shapes=[
                pltpu.VMEM((TN3, D), jnp.float32),    # x1 (post-attn residual)
                pltpu.VMEM((TN3, D), jnp.bfloat16),   # modulated LN(x1) (MXU input)
                pltpu.VMEM((TN3, D), jnp.float32),    # MLP output accumulator
            ],
        ),
        compiler_params=pltpu.CompilerParams(
            dimension_semantics=("parallel", "parallel", "arbitrary"),
            vmem_limit_bytes=_clamp_vmem_limit(k3_vmem, cap)),
        cost_estimate=k3_cost,
    )(x, attn, mod, w_proj, b_proj, w_fc1, b_fc1, w_fc2, b_fc2)

    return out


# ---------------------------- pure-JAX reference -------------------------------
def dit_block_ref(x, c, params, *, num_heads):
    B, N, D = x.shape
    H, Dh = num_heads, D // num_heads

    silu_c = c * jax.nn.sigmoid(c)
    ada = silu_c @ params["w_ada"] + params["b_ada"]
    (shift_msa, scale_msa, gate_msa,
     shift_mlp, scale_mlp, gate_mlp) = jnp.split(ada, 6, axis=1)

    def ln(v):
        mu = v.mean(-1, keepdims=True)
        var = ((v - mu) ** 2).mean(-1, keepdims=True)
        return (v - mu) / jnp.sqrt(var + 1e-6)

    h = ln(x) * (1.0 + scale_msa[:, None, :]) + shift_msa[:, None, :]
    qkv = h @ params["w_qkv"] + params["b_qkv"]
    qkv = qkv.reshape(B, N, 3, H, Dh).transpose(2, 0, 3, 1, 4)
    q, k, v = qkv[0], qkv[1], qkv[2]
    s = jnp.einsum("bhnd,bhmd->bhnm", q, k) * (Dh ** -0.5)
    p = jax.nn.softmax(s, axis=-1)
    a = jnp.einsum("bhnm,bhmd->bhnd", p, v).transpose(0, 2, 1, 3).reshape(B, N, D)
    a = a @ params["w_proj"] + params["b_proj"]
    x1 = x + gate_msa[:, None, :] * a

    h2 = ln(x1) * (1.0 + scale_mlp[:, None, :]) + shift_mlp[:, None, :]
    ff = jax.nn.gelu(h2 @ params["w_fc1"] + params["b_fc1"], approximate=True)
    ff = ff @ params["w_fc2"] + params["b_fc2"]
    return x1 + gate_mlp[:, None, :] * ff


if __name__ == "__main__":
    B, N, D = 2, 16, 32          # batch, tokens, hidden_size
    num_heads = 4
    mlp_ratio = 4.0
    mlp_hidden = int(D * mlp_ratio)

    key = jax.random.PRNGKey(0)
    keys = jax.random.split(key, 12)

    def w(k_, shape, scale=0.02):
        return (scale * jax.random.normal(k_, shape)).astype(jnp.float32)

    params = {
        "w_ada":  w(keys[0], (D, 6 * D)),
        "b_ada":  w(keys[1], (6 * D,)),
        "w_qkv":  w(keys[2], (D, 3 * D)),
        "b_qkv":  w(keys[3], (3 * D,)),
        "w_proj": w(keys[4], (D, D)),
        "b_proj": w(keys[5], (D,)),
        "w_fc1":  w(keys[6], (D, mlp_hidden)),
        "b_fc1":  w(keys[7], (mlp_hidden,)),
        "w_fc2":  w(keys[8], (mlp_hidden, D)),
        "b_fc2":  w(keys[9], (D,)),
    }

    x = jax.random.normal(keys[10], (B, N, D), dtype=jnp.float32)
    c = jax.random.normal(keys[11], (B, D), dtype=jnp.float32)

    out = jax.block_until_ready(dit_block(x, c, params, num_heads=num_heads))
    ref = jax.block_until_ready(dit_block_ref(x, c, params, num_heads=num_heads))

    assert out.shape == (B, N, D)
    max_err = float(jnp.max(jnp.abs(out - ref)))
    # bf16 matmuls (with f32 accumulation) vs. the all-f32 reference.
    assert max_err < 1e-2, f"max abs err = {max_err}"
    print("KERNEL_OK")
</pallas_src>

<mosaic_0001>
module attributes {stable_mosaic.version = 11 : i64} {
  func.func @_ln_mod_qkv_kernel(%arg0: i32, %arg1: i32, %arg2: memref<1x16x32xf32, #tpu.memory_space<vmem>>, %arg3: memref<1x6x32xf32, #tpu.memory_space<vmem>>, %arg4: memref<32x32xbf16, #tpu.memory_space<vmem>>, %arg5: memref<32x32xbf16, #tpu.memory_space<vmem>>, %arg6: memref<32x32xbf16, #tpu.memory_space<vmem>>, %arg7: memref<1x32xf32, #tpu.memory_space<vmem>>, %arg8: memref<1x32xf32, #tpu.memory_space<vmem>>, %arg9: memref<1x32xf32, #tpu.memory_space<vmem>>, %arg10: memref<1x16x32xbf16, #tpu.memory_space<vmem>>, %arg11: memref<1x4x16x8xbf16, #tpu.memory_space<vmem>>, %arg12: memref<1x4x16x8xbf16, #tpu.memory_space<vmem>>) attributes {dimension_semantics = [#tpu.dimension_semantics<parallel>, #tpu.dimension_semantics<parallel>], iteration_bounds = array<i64: 2, 1>, scalar_prefetch = 0 : i64, scratch_operands = 0 : i64, tpu.core_type = #tpu.core_type<tc>, window_params = [{transform_indices = @transform_0, window_bounds = array<i64: 1, 16, 32>}, {transform_indices = @transform_1, window_bounds = array<i64: 1, 6, 32>}, {pipeline_mode = #tpu.pipeline_mode<synchronous>, transform_indices = @transform_2, window_bounds = array<i64: 32, 32>}, {pipeline_mode = #tpu.pipeline_mode<synchronous>, transform_indices = @transform_3, window_bounds = array<i64: 32, 32>}, {pipeline_mode = #tpu.pipeline_mode<synchronous>, transform_indices = @transform_4, window_bounds = array<i64: 32, 32>}, {pipeline_mode = #tpu.pipeline_mode<synchronous>, transform_indices = @transform_5, window_bounds = array<i64: 1, 32>}, {pipeline_mode = #tpu.pipeline_mode<synchronous>, transform_indices = @transform_6, window_bounds = array<i64: 1, 32>}, {pipeline_mode = #tpu.pipeline_mode<synchronous>, transform_indices = @transform_7, window_bounds = array<i64: 1, 32>}, {transform_indices = @transform_8, window_bounds = array<i64: 1, 16, 32>}, {transform_indices = @transform_9, window_bounds = array<i64: 1, 4, 16, 8>}, {transform_indices = @transform_10, window_bounds = array<i64: 1, 4, 16, 8>}]} {
    %c0 = arith.constant 0 : index
    %c0_0 = arith.constant 0 : index
    %c0_1 = arith.constant 0 : index
    %0 = vector.load %arg2[%c0, %c0_0, %c0_1] : memref<1x16x32xf32, #tpu.memory_space<vmem>>, vector<1x16x32xf32>
    %1 = vector.shape_cast %0 : vector<1x16x32xf32> to vector<16x32xf32>
    %c0_2 = arith.constant 0 : index
    %c0_3 = arith.constant 0 : index
    %c0_4 = arith.constant 0 : index
    %2 = vector.load %arg3[%c0_2, %c0_3, %c0_4] : memref<1x6x32xf32, #tpu.memory_space<vmem>>, vector<1x6x32xf32>
    %3 = vector.shape_cast %2 : vector<1x6x32xf32> to vector<6x32xf32>
    %4 = vector.extract_strided_slice %3 {offsets = [0, 0], sizes = [1, 32], strides = [1, 1]} : vector<6x32xf32> to vector<1x32xf32>
    %5 = vector.extract_strided_slice %3 {offsets = [1, 0], sizes = [1, 32], strides = [1, 1]} : vector<6x32xf32> to vector<1x32xf32>
    %cst = arith.constant dense<0.000000e+00> : vector<16xf32>
    %6 = vector.multi_reduction <add>, %1, %cst [1] : vector<16x32xf32> to vector<16xf32>
    %7 = vector.shape_cast %6 : vector<16xf32> to vector<16x1xf32>
    %cst_5 = arith.constant 3.200000e+01 : f32
    %8 = vector.broadcast %cst_5 : f32 to vector<16x1xf32>
    %9 = arith.divf %7, %8 : vector<16x1xf32>
    %10 = arith.mulf %1, %1 : vector<16x32xf32>
    %cst_6 = arith.constant dense<0.000000e+00> : vector<16xf32>
    %11 = vector.multi_reduction <add>, %10, %cst_6 [1] : vector<16x32xf32> to vector<16xf32>
    %12 = vector.shape_cast %11 : vector<16xf32> to vector<16x1xf32>
    %cst_7 = arith.constant 3.200000e+01 : f32
    %13 = vector.broadcast %cst_7 : f32 to vector<16x1xf32>
    %14 = arith.divf %12, %13 : vector<16x1xf32>
    %15 = arith.mulf %9, %9 : vector<16x1xf32>
    %16 = arith.subf %14, %15 : vector<16x1xf32>
    %17 = vector.broadcast %9 : vector<16x1xf32> to vector<16x32xf32>
    %18 = arith.subf %1, %17 : vector<16x32xf32>
    %cst_8 = arith.constant 9.99999997E-7 : f32
    %19 = vector.broadcast %cst_8 : f32 to vector<16x1xf32>
    %20 = arith.addf %16, %19 : vector<16x1xf32>
    %21 = math.rsqrt %20 : vector<16x1xf32>
    %22 = vector.broadcast %21 : vector<16x1xf32> to vector<16x32xf32>
    %23 = arith.mulf %18, %22 : vector<16x32xf32>
    %cst_9 = arith.constant 1.000000e+00 : f32
    %24 = vector.broadcast %cst_9 : f32 to vector<1x32xf32>
    %25 = arith.addf %24, %5 : vector<1x32xf32>
    %26 = vector.broadcast %25 : vector<1x32xf32> to vector<16x32xf32>
    %27 = arith.mulf %23, %26 : vector<16x32xf32>
    %28 = vector.broadcast %4 : vector<1x32xf32> to vector<16x32xf32>
    %29 = arith.addf %27, %28 : vector<16x32xf32>
    %30 = arith.truncf %29 : vector<16x32xf32> to vector<16x32xbf16>
    %c0_10 = arith.constant 0 : index
    %c0_11 = arith.constant 0 : index
    %31 = vector.load %arg4[%c0_10, %c0_11] : memref<32x32xbf16, #tpu.memory_space<vmem>>, vector<32x32xbf16>
    %cst_12 = arith.constant dense<0.000000e+00> : vector<16x32xf32>
    %32 = tpu.matmul %30, %31, %cst_12 {dimension_numbers = #tpu.dot_dimension_numbers<[1], [0], [0], [1], [0, 0, 1, 1], [], []>} : vector<16x32xbf16>, vector<32x32xbf16>, vector<16x32xf32> -> vector<16x32xf32>
    %c0_13 = arith.constant 0 : index
    %c0_14 = arith.constant 0 : index
    %33 = vector.load %arg7[%c0_13, %c0_14] : memref<1x32xf32, #tpu.memory_space<vmem>>, vector<1x32xf32>
    %34 = vector.broadcast %33 : vector<1x32xf32> to vector<16x32xf32>
    %35 = arith.addf %32, %34 : vector<16x32xf32>
    %36 = arith.truncf %35 : vector<16x32xf32> to vector<16x32xbf16>
    %c0_15 = arith.constant 0 : index
    %c0_16 = arith.constant 0 : index
    %c0_17 = arith.constant 0 : index
    %37 = vector.load %arg10[%c0_15, %c0_16, %c0_17] : memref<1x16x32xbf16, #tpu.memory_space<vmem>>, vector<1x16x32xbf16>
    %38 = vector.shape_cast %37 : vector<1x16x32xbf16> to vector<16x32xbf16>
    %39 = vector.shape_cast %36 : vector<16x32xbf16> to vector<1x16x32xbf16>
    tpu.vector_store %arg10[%c0_15, %c0_16, %c0_17], %39 {strides = array<i32>} : memref<1x16x32xbf16, #tpu.memory_space<vmem>>, vector<1x16x32xbf16>,
    %c0_18 = arith.constant 0 : index
    %c0_19 = arith.constant 0 : index
    %40 = vector.load %arg5[%c0_18, %c0_19] : memref<32x32xbf16, #tpu.memory_space<vmem>>, vector<32x32xbf16>
    %cst_20 = arith.constant dense<0.000000e+00> : vector<16x32xf32>
    %41 = tpu.matmul %30, %40, %cst_20 {dimension_numbers = #tpu.dot_dimension_numbers<[1], [0], [0], [1], [0, 0, 1, 1], [], []>} : vector<16x32xbf16>, vector<32x32xbf16>, vector<16x32xf32> -> vector<16x32xf32>
    %c0_21 = arith.constant 0 : index
    %c0_22 = arith.constant 0 : index
    %42 = vector.load %arg8[%c0_21, %c0_22] : memref<1x32xf32, #tpu.memory_space<vmem>>, vector<1x32xf32>
    %43 = vector.broadcast %42 : vector<1x32xf32> to vector<16x32xf32>
    %44 = arith.addf %41, %43 : vector<16x32xf32>
    %45 = arith.truncf %44 : vector<16x32xf32> to vector<16x32xbf16>
    %c0_23 = arith.constant 0 : index
    %c0_24 = arith.constant 0 : index
    %46 = vector.load %arg6[%c0_23, %c0_24] : memref<32x32xbf16, #tpu.memory_space<vmem>>, vector<32x32xbf16>
    %cst_25 = arith.constant dense<0.000000e+00> : vector<16x32xf32>
    %47 = tpu.matmul %30, %46, %cst_25 {dimension_numbers = #tpu.dot_dimension_numbers<[1], [0], [0], [1], [0, 0, 1, 1], [], []>} : vector<16x32xbf16>, vector<32x32xbf16>, vector<16x32xf32> -> vector<16x32xf32>
    %c0_26 = arith.constant 0 : index
    %c0_27 = arith.constant 0 : index
    %48 = vector.load %arg9[%c0_26, %c0_27] : memref<1x32xf32, #tpu.memory_space<vmem>>, vector<1x32xf32>
    %49 = vector.broadcast %48 : vector<1x32xf32> to vector<16x32xf32>
    %50 = arith.addf %47, %49 : vector<16x32xf32>
    %51 = arith.truncf %50 : vector<16x32xf32> to vector<16x32xbf16>
    %52 = vector.extract_strided_slice %45 {offsets = [0, 0], sizes = [16, 8], strides = [1, 1]} : vector<16x32xbf16> to vector<16x8xbf16>
    %c0_28 = arith.constant 0 : index
    %c0_29 = arith.constant 0 : index
    %c0_30 = arith.constant 0 : index
    %c0_31 = arith.constant 0 : index
    %53 = vector.load %arg11[%c0_28, %c0_29, %c0_30, %c0_31] : memref<1x4x16x8xbf16, #tpu.memory_space<vmem>>, vector<1x1x16x8xbf16>
    %54 = vector.shape_cast %53 : vector<1x1x16x8xbf16> to vector<16x8xbf16>
    %55 = vector.shape_cast %52 : vector<16x8xbf16> to vector<1x1x16x8xbf16>
    tpu.vector_store %arg11[%c0_28, %c0_29, %c0_30, %c0_31], %55 {strides = array<i32>} : memref<1x4x16x8xbf16, #tpu.memory_space<vmem>>, vector<1x1x16x8xbf16>,
    %56 = vector.extract_strided_slice %51 {offsets = [0, 0], sizes = [16, 8], strides = [1, 1]} : vector<16x32xbf16> to vector<16x8xbf16>
    %c0_32 = arith.constant 0 : index
    %c0_33 = arith.constant 0 : index
    %c0_34 = arith.constant 0 : index
    %c0_35 = arith.constant 0 : index
    %57 = vector.load %arg12[%c0_32, %c0_33, %c0_34, %c0_35] : memref<1x4x16x8xbf16, #tpu.memory_space<vmem>>, vector<1x1x16x8xbf16>
    %58 = vector.shape_cast %57 : vector<1x1x16x8xbf16> to vector<16x8xbf16>
    %59 = vector.shape_cast %56 : vector<16x8xbf16> to vector<1x1x16x8xbf16>
    tpu.vector_store %arg12[%c0_32, %c0_33, %c0_34, %c0_35], %59 {strides = array<i32>} : memref<1x4x16x8xbf16, #tpu.memory_space<vmem>>, vector<1x1x16x8xbf16>,
    %60 = vector.extract_strided_slice %45 {offsets = [0, 8], sizes = [16, 8], strides = [1, 1]} : vector<16x32xbf16> to vector<16x8xbf16>
    %c0_36 = arith.constant 0 : index
    %c1 = arith.constant 1 : index
    %c0_37 = arith.constant 0 : index
    %c0_38 = arith.constant 0 : index
    %61 = vector.load %arg11[%c0_36, %c1, %c0_37, %c0_38] : memref<1x4x16x8xbf16, #tpu.memory_space<vmem>>, vector<1x1x16x8xbf16>
    %62 = vector.shape_cast %61 : vector<1x1x16x8xbf16> to vector<16x8xbf16>
    %63 = vector.shape_cast %60 : vector<16x8xbf16> to vector<1x1x16x8xbf16>
    tpu.vector_store %arg11[%c0_36, %c1, %c0_37, %c0_38], %63 {strides = array<i32>} : memref<1x4x16x8xbf16, #tpu.memory_space<vmem>>, vector<1x1x16x8xbf16>,
    %64 = vector.extract_strided_slice %51 {offsets = [0, 8], sizes = [16, 8], strides = [1, 1]} : vector<16x32xbf16> to vector<16x8xbf16>
    %c0_39 = arith.constant 0 : index
    %c1_40 = arith.constant 1 : index
    %c0_41 = arith.constant 0 : index
    %c0_42 = arith.constant 0 : index
    %65 = vector.load %arg12[%c0_39, %c1_40, %c0_41, %c0_42] : memref<1x4x16x8xbf16, #tpu.memory_space<vmem>>, vector<1x1x16x8xbf16>
    %66 = vector.shape_cast %65 : vector<1x1x16x8xbf16> to vector<16x8xbf16>
    %67 = vector.shape_cast %64 : vector<16x8xbf16> to vector<1x1x16x8xbf16>
    tpu.vector_store %arg12[%c0_39, %c1_40, %c0_41, %c0_42], %67 {strides = array<i32>} : memref<1x4x16x8xbf16, #tpu.memory_space<vmem>>, vector<1x1x16x8xbf16>,
    %68 = vector.extract_strided_slice %45 {offsets = [0, 16], sizes = [16, 8], strides = [1, 1]} : vector<16x32xbf16> to vector<16x8xbf16>
    %c0_43 = arith.constant 0 : index
    %c2 = arith.constant 2 : index
    %c0_44 = arith.constant 0 : index
    %c0_45 = arith.constant 0 : index
    %69 = vector.load %arg11[%c0_43, %c2, %c0_44, %c0_45] : memref<1x4x16x8xbf16, #tpu.memory_space<vmem>>, vector<1x1x16x8xbf16>
    %70 = vector.shape_cast %69 : vector<1x1x16x8xbf16> to vector<16x8xbf16>
    %71 = vector.shape_cast %68 : vector<16x8xbf16> to vector<1x1x16x8xbf16>
    tpu.vector_store %arg11[%c0_43, %c2, %c0_44, %c0_45], %71 {strides = array<i32>} : memref<1x4x16x8xbf16, #tpu.memory_space<vmem>>, vector<1x1x16x8xbf16>,
    %72 = vector.extract_strided_slice %51 {offsets = [0, 16], sizes = [16, 8], strides = [1, 1]} : vector<16x32xbf16> to vector<16x8xbf16>
    %c0_46 = arith.constant 0 : index
    %c2_47 = arith.constant 2 : index
    %c0_48 = arith.constant 0 : index
    %c0_49 = arith.constant 0 : index
    %73 = vector.load %arg12[%c0_46, %c2_47, %c0_48, %c0_49] : memref<1x4x16x8xbf16, #tpu.memory_space<vmem>>, vector<1x1x16x8xbf16>
    %74 = vector.shape_cast %73 : vector<1x1x16x8xbf16> to vector<16x8xbf16>
    %75 = vector.shape_cast %72 : vector<16x8xbf16> to vector<1x1x16x8xbf16>
    tpu.vector_store %arg12[%c0_46, %c2_47, %c0_48, %c0_49], %75 {strides = array<i32>} : memref<1x4x16x8xbf16, #tpu.memory_space<vmem>>, vector<1x1x16x8xbf16>,
    %76 = vector.extract_strided_slice %45 {offsets = [0, 24], sizes = [16, 8], strides = [1, 1]} : vector<16x32xbf16> to vector<16x8xbf16>
    %c0_50 = arith.constant 0 : index
    %c3 = arith.constant 3 : index
    %c0_51 = arith.constant 0 : index
    %c0_52 = arith.constant 0 : index
    %77 = vector.load %arg11[%c0_50, %c3, %c0_51, %c0_52] : memref<1x4x16x8xbf16, #tpu.memory_space<vmem>>, vector<1x1x16x8xbf16>
    %78 = vector.shape_cast %77 : vector<1x1x16x8xbf16> to vector<16x8xbf16>
    %79 = vector.shape_cast %76 : vector<16x8xbf16> to vector<1x1x16x8xbf16>
    tpu.vector_store %arg11[%c0_50, %c3, %c0_51, %c0_52], %79 {strides = array<i32>} : memref<1x4x16x8xbf16, #tpu.memory_space<vmem>>, vector<1x1x16x8xbf16>,
    %80 = vector.extract_strided_slice %51 {offsets = [0, 24], sizes = [16, 8], strides = [1, 1]} : vector<16x32xbf16> to vector<16x8xbf16>
    %c0_53 = arith.constant 0 : index
    %c3_54 = arith.constant 3 : index
    %c0_55 = arith.constant 0 : index
    %c0_56 = arith.constant 0 : index
    %81 = vector.load %arg12[%c0_53, %c3_54, %c0_55, %c0_56] : memref<1x4x16x8xbf16, #tpu.memory_space<vmem>>, vector<1x1x16x8xbf16>
    %82 = vector.shape_cast %81 : vector<1x1x16x8xbf16> to vector<16x8xbf16>
    %83 = vector.shape_cast %80 : vector<16x8xbf16> to vector<1x1x16x8xbf16>
    tpu.vector_store %arg12[%c0_53, %c3_54, %c0_55, %c0_56], %83 {strides = array<i32>} : memref<1x4x16x8xbf16, #tpu.memory_space<vmem>>, vector<1x1x16x8xbf16>,
    return
  }
  func.func @transform_0(%arg0: i32, %arg1: i32) -> (i32, i32, i32) {
    %c0_i32 = arith.constant 0 : i32
    %c0_i32_0 = arith.constant 0 : i32
    return %arg0, %arg1, %c0_i32 : i32, i32, i32
  }
  func.func @transform_1(%arg0: i32, %arg1: i32) -> (i32, i32, i32) {
    %c0_i32 = arith.constant 0 : i32
    %c0_i32_0 = arith.constant 0 : i32
    %c0_i32_1 = arith.constant 0 : i32
    return %arg0, %c0_i32, %c0_i32_0 : i32, i32, i32
  }
  func.func @transform_2(%arg0: i32, %arg1: i32) -> (i32, i32) {
    %c0_i32 = arith.constant 0 : i32
    %c0_i32_0 = arith.constant 0 : i32
    %c0_i32_1 = arith.constant 0 : i32
    return %c0_i32, %c0_i32_0 : i32, i32
  }
  func.func @transform_3(%arg0: i32, %arg1: i32) -> (i32, i32) {
    %c0_i32 = arith.constant 0 : i32
    %c0_i32_0 = arith.constant 0 : i32
    %c0_i32_1 = arith.constant 0 : i32
    return %c0_i32, %c0_i32_0 : i32, i32
  }
  func.func @transform_4(%arg0: i32, %arg1: i32) -> (i32, i32) {
    %c0_i32 = arith.constant 0 : i32
    %c0_i32_0 = arith.constant 0 : i32
    %c0_i32_1 = arith.constant 0 : i32
    return %c0_i32, %c0_i32_0 : i32, i32
  }
  func.func @transform_5(%arg0: i32, %arg1: i32) -> (i32, i32) {
    %c0_i32 = arith.constant 0 : i32
    %c0_i32_0 = arith.constant 0 : i32
    %c0_i32_1 = arith.constant 0 : i32
    return %c0_i32, %c0_i32_0 : i32, i32
  }
  func.func @transform_6(%arg0: i32, %arg1: i32) -> (i32, i32) {
    %c0_i32 = arith.constant 0 : i32
    %c0_i32_0 = arith.constant 0 : i32
    %c0_i32_1 = arith.constant 0 : i32
    return %c0_i32, %c0_i32_0 : i32, i32
  }
  func.func @transform_7(%arg0: i32, %arg1: i32) -> (i32, i32) {
    %c0_i32 = arith.constant 0 : i32
    %c0_i32_0 = arith.constant 0 : i32
    %c0_i32_1 = arith.constant 0 : i32
    return %c0_i32, %c0_i32_0 : i32, i32
  }
  func.func @transform_8(%arg0: i32, %arg1: i32) -> (i32, i32, i32) {
    %c0_i32 = arith.constant 0 : i32
    %c0_i32_0 = arith.constant 0 : i32
    return %arg0, %arg1, %c0_i32 : i32, i32, i32
  }
  func.func @transform_9(%arg0: i32, %arg1: i32) -> (i32, i32, i32, i32) {
    %c0_i32 = arith.constant 0 : i32
    %c0_i32_0 = arith.constant 0 : i32
    %c0_i32_1 = arith.constant 0 : i32
    return %arg0, %c0_i32, %arg1, %c0_i32_0 : i32, i32, i32, i32
  }
  func.func @transform_10(%arg0: i32, %arg1: i32) -> (i32, i32, i32, i32) {
    %c0_i32 = arith.constant 0 : i32
    %c0_i32_0 = arith.constant 0 : i32
    %c0_i32_1 = arith.constant 0 : i32
    return %arg0, %c0_i32, %arg1, %c0_i32_0 : i32, i32, i32, i32
  }
}

</mosaic_0001>

<bundles_post_ra>
// kernel: tpu_custom_call.1
= control target key start
LH: loop header
LB: loop body
LE: loop exit
PB: predicated region body
PF: predicated region fallthrough
CT: control target
= control target key end

     0   :  { %s1648_s0 = inlined_call_operand.hbm [shape: f32[2,16,32], index: 0, kind: input, shape index: {}]   ;;  %s1649_s1 = inlined_call_operand.vmem [shape: f32[2,6,32], index: 1, kind: input, shape index: {}]   ;;  %s1650_s2 = inlined_call_operand.vmem [shape: bf16[32,32], index: 2, kind: input, shape index: {}]   ;;  %s1651_s3 = inlined_call_operand.hbm [shape: bf16[32,32], index: 3, kind: input, shape index: {}]   ;;  %s1652_s4 = inlined_call_operand.hbm [shape: bf16[32,32], index: 4, kind: input, shape index: {}]   ;;  %s1653_s5 = inlined_call_operand.vmem [shape: f32[1,32], index: 5, kind: input, shape index: {}]   ;;  %s1654_s6 = inlined_call_operand.vmem [shape: f32[1,32], index: 6, kind: input, shape index: {}]   ;;  %s1655_s7 = inlined_call_operand.vmem [shape: f32[1,32], index: 7, kind: input, shape index: {}]   ;;  %s1656_s8 = inlined_call_operand.hbm [shape: bf16[2,16,32], index: 8, kind: output, shape index: {0}]   ;;  %s1657_s9 = inlined_call_operand.vmem [shape: bf16[2,4,16,8], index: 9, kind: output, shape index: {1}]   ;;  %s1658_s10 = inlined_call_operand.vmem [shape: bf16[2,4,16,8], index: 10, kind: output, shape index: {2}]  }
   0x1   :  { %1665 = sst [smem:[#allocation16_spill]] %s1651_s3 }
   0x2   :  { %1666 = sst [smem:[#allocation17_spill]] %s1652_s4 }
   0x3   :  { %1667 = sst [smem:[#allocation18_spill]] %s1656_s8 }
   0x4   :  { %1668 = sst [smem:[#allocation19_spill]] %s1658_s10 }
   0x5   :  { %16 = vsyncpa [#allocation3], 0 }
   0x6   :  { %18 = vsyncpa [#allocation3 + $0x1], 0 }
   0x7   :  { %19 = vsyncpa [#allocation6], 0 }
   0x8   :  { %20 = vsyncpa [#allocation4], 0 }
   0x9   :  { %22 = vsyncpa [#allocation4 + $0x1], 0  ;;  %s1398_s13 = smov 0   ;;  %s1400_s14 = smov 0  }
   0xa   :  { %s1402_s15 = smov 0   ;;  %s1404_s16 = smov 0  }
   0xb   :  { %s1406_s17 = smov 0   ;;  %s1408_s18 = smov 0  }
   0xc LB: > { %1669 = sst [smem:[#allocation12_spill]] %s1309_s13  ;;  %s978_s19 = sadd.s32 4294967295, %s1329_s18   ;;  %s1329_s18 = sphi %s1408_s18, %s28_s18   ;;  %s1325_s17 = sphi %s1406_s17, %s1692_s17   ;;  %s1321_s16 = sphi %s1404_s16, %s1691_s16   ;;  %s1317_s15 = sphi %s1402_s15, %s1690_s15   ;;  %s1313_s14 = sphi %s1400_s14, %s1689_s14   ;;  %s1309_s13 = sphi %s1398_s13, %s1688_s13  }
   0xd   : > { %s979_s20 = sadd.s32 4294967294, %s1329_s18   ;;  %p62_p0 = scmp.ne.s32.totalorder %s1313_s14, %s1309_s13 }
   0xe   : > { %p1432_p1 = scmp.eq.s32.totalorder %s978_s19, 0  ;;  %p1436_p2 = scmp.eq.s32.totalorder %s978_s19, 1 }
   0xf   : > { %p246_p3 = scmp.eq.s32.totalorder %s979_s20, 1  ;;  %p980_p5 = scmp.ge.s32.totalorder %s1329_s18, 1 }
  0x10   : > { %p1442_p4 = por %p1432_p1, %p62_p0  ;;  %p309_p7 = scmp.lt.s32.totalorder %s1329_s18, 3 }
  0x11   : > { %p1447_p6 = por %p246_p3, %p62_p0  ;;  %s1675_s3 = sld [smem:[#allocation16_spill]] }
  0x12   : > { %p1455_p8 = pnand %p980_p5, %p309_p7  ;;  %s1331_s29 = smov [#allocation5]  }
  0x13   : > { %s1673_s24 = scalar_select %p1447_p6, 1, 0 }
  0x14   : > { %p1063_p9 = pneg %p1455_p8  ;;  %s325_s30 = sshll.u32 %s1331_s29, 4  ;;  %s326_s30 = int_to_ptr.vmem [resolvable:$true] %s325_s30 }
  0x15   : > { %1674 = sst [smem:[#allocation13_spill]] %s1673_s24  ;;  %p983_p11 = scmp.ge.s32.totalorder %s1329_s18, 2 }
  0x16   : > { %p1064_p10 = pnand %p1063_p9, %p1432_p1  ;;  %s1677_s4 = sld [smem:[#allocation17_spill]] }
  0x17   : > { %s323_s27 = sshll.u32 %s1675_s3, 4  ;;  %s1332_s20 = smov 64   ;;  %s324_s27 = int_to_ptr.hbm [resolvable:$true] %s323_s27 }
  0x18   : > { %s1333_s25 = smov 4   ;;  %s1334_s26 = smov [#allocation7]  }
  0x19   : > { %1066 = dma.hbm_to_vmem [thread:$0]  (!%p1064_p10), %s324_s27, 256, %s326_s30, [#allocation6], %s1332_s20, %s1332_s20, %s1333_s25  }
  0x1a   : > { %s339_s29 = sshll.u32 %s1334_s26, 4  ;;  %s40_s3 = sadd.s32 1, %s1325_s17  ;;  %s340_s29 = int_to_ptr.vmem [resolvable:$true] %s339_s29 }
  0x1b   : > { %s49_s24 = sadd.s32 1, %s1317_s15  ;;  %p42_p12 = scmp.ge.s32.totalorder %s40_s3, 2 }
  0x1c   : > { %s337_s19 = sshll.u32 %s1677_s4, 4  ;;  %p56_p13 = scmp.ne.s32.totalorder %s1317_s15, %s1313_s14  ;;  %s338_s19 = int_to_ptr.hbm [resolvable:$true] %s337_s19 }
  0x1d   : > { %1069 = dma.hbm_to_vmem [thread:$0]  (!%p1064_p10), %s338_s19, 256, %s340_s29, [#allocation6], %s1332_s20, %s1332_s20, %s1333_s25  }
  0x1e   : > { %p57_p0 = scmp.eq.s32.totalorder %s1329_s18, 0  ;;  %p1080_p3 = scmp.lt.s32.totalorder %s1329_s18, 2 }
  0x1f   : > { %s1694_s3 = smov (%p42_p12, %s40_s3), 0  ;;  %p1481_p7 = por %p1436_p2, %p56_p13 }
  0x20   : > { %1678 = sst [smem:[#allocation14_spill]] %s1694_s3  ;;  %p1475_p5 = por %p57_p0, %p56_p13 }
  0x21   : > { %s1680_s27 = scalar_select %p1481_p7, 1, 0 }
  0x22   : > { %s44_s30 = ssub.s32 %s1325_s17, %s1694_s3  ;;  %s362_s12 = sand.u32 1, %s1317_s15  }
  0x23   : > { %1681 = sst [smem:[#allocation15_spill]] %s1680_s27  ;;  %p47_p9 = scmp.eq.s32.totalorder %s44_s30, 0 }
  0x24   : > { %s984_s19 = sshll.u32 %s362_s12, 4  ;;  %s1041_s20 = sshll.u32 %s1325_s17, 4 }
  0x25   : > { %s1490_s25 = scalar_select %p47_p9, %s1317_s15, %s49_s24  }
  0x26   : > { %s373_s4 = scalar_lea.hbm %s1648_s0, %s1041_s20  ;;  %s366_s8 = scalar_lea.vmem [#allocation2], %s984_s19 }
  0x27   : > { %s374_s13 = sshll.u32 %s373_s4, 4  ;;  %s376_s10 = sshll.u32 %s366_s8, 4  ;;  %s375_s13 = int_to_ptr.hbm [resolvable:$true] %s374_s13  ;;  %s377_s10 = int_to_ptr.vmem [resolvable:$true] %s376_s10 }
  0x28   : > { %p1071_p2 = pnand %p1080_p3, %p1475_p5  ;;  %s363_s22 = scalar_lea.sflag [#allocation3], %s362_s12 }
  0x29   : > { %s1335_s3 = smov 128   ;;  %s1336_s27 = smov 8  }
  0x2a   : > { %1073 = dma.hbm_to_vmem [thread:$0]  (!%p1071_p2), %s375_s13, 256, %s377_s10, %s363_s22, %s1335_s3, %s1335_s3, %s1336_s27  }
  0x2b   : > { %395 = sbr.rel (%p1455_p8) target bundleno = 482 (0x1e2), region = 52  ;;  %s1502_s24 = sand.u32 (!%p1455_p8), 1, %s1313_s14  }
  0x2c   : > { %s988_s4 = sshll.u32 (!%p1455_p8), %s1502_s24, 4  ;;  %s398_s8 = scalar_lea.sflag (!%p1455_p8), [#allocation3], %s1502_s24 }
  0x2d   : > { %s401_s30 = scalar_lea.vmem (!%p1455_p8), [#allocation2], %s988_s4 }
  0x30   : > { %1296 = dma.done.wait (%p1442_p4), %s398_s8, 256  }
  0x31   : > { %1298 = vsyncadd (%p1442_p4), %s398_s8, 4294967040 }
  0x32   : > { %1300 = dma.done.wait (%p1432_p1), [#allocation6], 512  }
  0x33   : > { %1302 = vsyncadd (%p1432_p1), [#allocation6], 4294966784  ;;  %vm501_vm0 = vcmask 261120   ;;  %v1514_v0 = vld [vmem:[%s401_s30] sm:$0xff]  ;;  %v1520_v3 = vld [vmem:[%s401_s30 + $0x8] sm:$0xff]  ;;  %v1337_v8 = vmov 32.0  }
  0x34   : > { %v502_v1 = vsel %vm501_vm0, %v1514_v0, 0.0  ;;  %v517_v2 = vmul.f32 %v1514_v0, %v1514_v0  ;;  %v518_v5 = vmul.f32 %v1520_v3, %v1520_v3  ;;  %v505_v6 = vsel %vm501_vm0, %v1520_v3, 0.0  ;;  %v1045_v18 = vld [vmem:[%s1650_s2 + $0x8] sm:$0xff]  ;;  %v1049_v20 = vld [vmem:[#allocation7 + $0x8] sm:$0xff]  ;;  %v1044_v23 = vld [vmem:[%s1650_s2] sm:$0xff]  ;;  %p472_p1 = scmp.lt.s32.totalorder %s1321_s16, 1 }
  0x35   : > { %503 = vadd.xlane.f32.xlu0 %v502_v1  ;;  %1147 = vrcp.f32 %v1337_v8  ;;  %v1047_v19 = vld [vmem:[#allocation5 + $0x8] sm:$0xff]  ;;  %594 = vmatpush.bf16.msra.mxu0 %v1045_v18  ;;  %v1046_v24 = vld [vmem:[#allocation5] sm:$0xff]  ;;  %v1048_v26 = vld [vmem:[#allocation7] sm:$0xff]  ;;  %s991_s22 = sshll.u32 %s1502_s24, 3  ;;  %vm604_vm8 = vcmask 257024   ;;  %vm679_vm9 = vcmask 60416  }
  0x36   : > { %v519_v4 = vsel %vm501_vm0, %v517_v2, 0.0  ;;  %v522_v7 = vsel %vm501_vm0, %v518_v5, 0.0  ;;  %633 = vmatpush.bf16.msra.mxu1 %v1047_v19  ;;  %669 = vmatpush.bf16.msra.mxu2 %v1049_v20  ;;  %s1536_s23 = scalar_select %p472_p1, %s1321_s16, 1  ;;  %v1144_v62 = vld [vmem:[%s1653_s5] ss:$0 sm:$0xff] }
  0x37   : > { %520 = vadd.xlane.f32.xlu1 %v519_v4  ;;  %v1145_v63 = vld [vmem:[%s1654_s6] ss:$0 sm:$0xff]  ;;  %s448_s21 = scalar_lea.vmem [#allocation8], %s991_s22  ;;  %s1682_s27 = sld [smem:[#allocation19_spill]] }
  0x38   : > { %s992_s28 = sshll.u32 %s1536_s23, 3  ;;  %s1042_s4 = sshll.u32 %s1536_s23, 5 }
  0x39   : > { %595 = vmatpush.bf16.msra.mxu0 %v1044_v23  ;;  %s475_s12 = scalar_lea.vmem %s1649_s1, %s992_s28  ;;  %s1558_s3 = scalar_lea.vmem %s1657_s9, %s1042_s4 }
  0x3a   : > { %634 = vmatpush.bf16.msra.mxu1 %v1046_v24  ;;  %670 = vmatpush.bf16.msra.mxu2 %v1048_v26  ;;  %v500_v43 = vld [vmem:[%s475_s12] sm:$0x3f]  ;;  %s1338_s23 = smov 120   ;;  %s1339_s19 = smov 112  }
  0x3b   : > { %v1148_v9 = vpop.eup %1147  ;;  %v557_v45 = vadd.f32 1.0, %v500_v43  ;;  %v561_v57 = vperm.slane %v500_v43, 0  ;;  %s1050_s20 = sshll.u32 %s1321_s16, 3  ;;  %s775_s26 = sshll.u32 %s448_s21, 4  ;;  %s776_s26 = int_to_ptr.vmem [resolvable:$true] %s775_s26 }
  0x3c   : > { %v509_v10 = vmul.f32 32.0, %v1148_v9  ;;  %vm513_vm1 = vweird.f32 %v1148_v9  ;;  %s1340_s13 = smov 104   ;;  %s743_s16 = scalar_lea.sflag [#allocation4], %s1502_s24 }
  0x3d   : > { %506 = vadd.xlane.f32.xlu0 %v505_v6  ;;  %v558_v51 = vperm.slane %v557_v45, 1  ;;  %v1146_v6 = vld [vmem:[%s1655_s7] ss:$0 sm:$0xff]  ;;  %s1570_s12 = scalar_lea.vmem %s1682_s27, %s1042_s4  ;;  %s1683_s4 = sld [smem:[#allocation18_spill]] }
  0x3e   : > { %v510_v11 = vsub.f32 1.0, %v509_v10 }
  0x3f   : > { %523 = vadd.xlane.f32.xlu1 %v522_v7 }
  0x40   : > { %v511_v12 = vmul.f32 %v1148_v9, %v510_v11 }
  0x42   : > { %v512_v13 = vadd.f32 %v1148_v9, %v511_v12 }
  0x43   : > { %s774_s8 = scalar_lea.hbm %s1683_s4, %s1050_s20  ;;  %s1263_s20 = scalar_lea.hbm %s1683_s4, 16 }
  0x44   : > { %v514_v14 = vsel %vm513_vm1, %v1148_v9, %v512_v13  ;;  %s777_s10 = sshll.u32 %s774_s8, 4  ;;  %s778_s10 = int_to_ptr.hbm [resolvable:$true] %s777_s10 }
  0xa8   : > { %v504_v15 = vpop.xlane.xlu0 %503 }
  0xa9   : > { %v515_v16 = vmul.f32 %v514_v14, %v504_v15 }
  0xaa   : > { %v521_v17 = vpop.xlane.xlu1 %520 }
  0xab   : > { %v527_v21 = vmul.f32 %v515_v16, %v515_v16  ;;  %v525_v22 = vmul.f32 %v521_v17, %v514_v14  ;;  %v531_v48 = vsub.f32 %v1514_v0, %v515_v16 }
  0xad   : > { %v529_v25 = vsub.f32 %v525_v22, %v527_v21 }
  0xaf   : > { %v533_v27 = vadd.f32 1e-06, %v529_v25 }
  0xb0   : > { %v507_v28 = vpop.xlane.xlu0 %506 }
  0xb1   : > { %1149 = vrsqrt.f32 %v533_v27  ;;  %v516_v29 = vmul.f32 %v514_v14, %v507_v28  ;;  %vm541_vm3 = vweird.f32 %v533_v27 }
  0xb2   : > { %v524_v30 = vpop.xlane.xlu1 %523 }
  0xb3   : > { %v528_v31 = vmul.f32 %v516_v29, %v516_v29  ;;  %v526_v32 = vmul.f32 %v524_v30, %v514_v14  ;;  %v532_v53 = vsub.f32 %v1520_v3, %v516_v29 }
  0xb5   : > { %v530_v33 = vsub.f32 %v526_v32, %v528_v31 }
  0xb7   : > { %v1150_v34 = vpop.eup %1149  ;;  %v534_v35 = vadd.f32 1e-06, %v530_v33 }
  0xb8   : > { %v536_v36 = vmul.f32 %v1150_v34, %v533_v27  ;;  %vm542_vm2 = vweird.f32 %v1150_v34 }
  0xb9   : > { %1151 = vrsqrt.f32 %v534_v35  ;;  %vm543_vm4 = vmor %vm541_vm3, %vm542_vm2  ;;  %vm551_vm6 = vweird.f32 %v534_v35 }
  0xba   : > { %v537_v37 = vmul.f32 %v1150_v34, %v536_v36 }
  0xbc   : > { %v538_v38 = vmul.f32 0.5, %v537_v37 }
  0xbe   : > { %v539_v39 = vsub.f32 1.5, %v538_v38 }
  0xbf   : > { %v1152_v40 = vpop.eup %1151 }
  0xc0   : > { %v540_v41 = vmul.f32 %v1150_v34, %v539_v39  ;;  %v546_v42 = vmul.f32 %v1152_v40, %v534_v35  ;;  %vm552_vm5 = vweird.f32 %v1152_v40 }
  0xc1   : > { %vm553_vm7 = vmor %vm551_vm6, %vm552_vm5 }
  0xc2   : > { %v547_v44 = vmul.f32 %v1152_v40, %v546_v42  ;;  %v544_v46 = vsel %vm543_vm4, %v1150_v34, %v540_v41 }
  0xc3   : > { %v555_v50 = vmul.f32 %v544_v46, %v531_v48 }
  0xc4   : > { %v548_v47 = vmul.f32 0.5, %v547_v44 }
  0xc5   : > { %v559_v56 = vmul.f32 %v558_v51, %v555_v50 }
  0xc6   : > { %v549_v49 = vsub.f32 1.5, %v548_v47 }
  0xc7   : > { %v562_v59 = vadd.f32 %v561_v57, %v559_v56 }
  0xc8   : > { %v550_v52 = vmul.f32 %v1152_v40, %v549_v49 }
  0xca   : > { %v554_v54 = vsel %vm553_vm7, %v1152_v40, %v550_v52 }
  0xcb   : > { %v556_v55 = vmul.f32 %v554_v54, %v532_v53 }
  0xcd   : > { %v560_v58 = vmul.f32 %v558_v51, %v556_v55 }
  0xcf   : > { %v563_v60 = vadd.f32 %v561_v57, %v560_v58 }
  0xd1   : > { %v564_v61 = vpack.c.bf16 %v563_v60, %v562_v59 }
  0xd3   : > { %1005 = vmatmul.msk.bf16.vlgmr.msra.gmra.mxu0 %vm501_vm0, %v564_v61  ;;  %1014 = vmatmul.msk.bf16.vlgmr.msra.gmra.mxu1 %vm501_vm0, %v564_v61 }
  0xd4   : > { %1023 = vmatmul.msk.bf16.vlgmr.msra.gmra.mxu2 %vm501_vm0, %v564_v61 }
 0x150   : > { %v597_v0 = vpop.f32.mrf.mxu0  ;;  %v636_v1 = vpop.f32.mrf.mxu1 }
 0x151   : > { %v598_v2 = vadd.f32 %v1144_v62, %v597_v0  ;;  %v637_v3 = vadd.f32 %v1145_v63, %v636_v1 }
 0x153   : > { %v602_v4 = vpack.c.bf16 %v598_v2, %v598_v2  ;;  %v641_v5 = vpack.c.bf16 %v637_v3, %v637_v3 }
 0x155   : > { %605 = vst.msk [vmem:[%s448_s21] sm:$0xf] %vm604_vm8, %v602_v4  ;;  %686 = vrot.lane.b32.xlu2 %v641_v5, %s1338_s23 }
 0x156   : > { %680 = vst.msk [vmem:[%s1558_s3] sm:$0xf] %vm679_vm9, %v641_v5 }
 0x157   : > { %v672_v7 = vpop.f32.mrf.mxu2 }
 0x158   : > { %v673_v8 = vadd.f32 %v1146_v6, %v672_v7  ;;  %v599_v9 = vpop.f32.mrf.mxu0  ;;  %v638_v10 = vpop.f32.mrf.mxu1 }
 0x159   : > { %v600_v11 = vadd.f32 %v1144_v62, %v599_v9  ;;  %v639_v12 = vadd.f32 %v1145_v63, %v638_v10 }
 0x15a   : > { %v677_v13 = vpack.c.bf16 %v673_v8, %v673_v8 }
 0x15b   : > { %v603_v14 = vpack.c.bf16 %v600_v11, %v600_v11  ;;  %v642_v15 = vpack.c.bf16 %v639_v12, %v639_v12 }
 0x15c   : > { %682 = vst.msk [vmem:[%s1570_s12] sm:$0xf] %vm679_vm9, %v677_v13  ;;  %697 = vrot.lane.b32.xlu0 %v677_v13, %s1338_s23 }
 0x15d   : > { %606 = vst.msk [vmem:[%s448_s21 + $0x4] sm:$0xf] %vm604_vm8, %v603_v14  ;;  %706 = vrot.lane.b32.xlu2 %v641_v5, %s1339_s19  ;;  %s1257_s21 = sshra.s32 %s778_s10, 4  ;;  %s1258_s21 = int_to_ptr.hbm [resolvable:$true] %s1257_s21 }
 0x15e   : > { %681 = vst.msk [vmem:[%s1558_s3 + $0x4] sm:$0xf] %vm679_vm9, %v642_v15  ;;  %s1259_s28 = scalar_lea.hbm %s1258_s21, 8  ;;  %p1264_p12 = scmp.lt.s32.totalorder %s1258_s21, %s1683_s4 }
 0x15f   : > { %v674_v16 = vpop.f32.mrf.mxu2  ;;  %p1260_p4 = scmp.ne.s32.totalorder %s1258_s21, %s1259_s28  ;;  %p1265_p13 = scmp.lt.s32.totalorder %s1263_s20, %s1259_s28 }
 0x160   : > { %v675_v17 = vadd.f32 %v1146_v6, %v674_v16 }
 0x161   : > { %p1261_p8 = pnand %p1260_p4, %p1481_p7  ;;  %p1266_p0 = por %p1265_p13, %p1264_p12 }
 0x162   : > { %v678_v18 = vpack.c.bf16 %v675_v17, %v675_v17 }
 0x163   : > { %p1262_p10 = pneg %p1261_p8 }
 0x164   : > { %683 = vst.msk [vmem:[%s1570_s12 + $0x4] sm:$0xf] %vm679_vm9, %v678_v18  ;;  %699 = vrot.lane.b32.xlu1 %v678_v18, %s1338_s23  ;;  %717 = vrot.lane.b32.xlu0 %v678_v18, %s1339_s19 }
 0x165   : > { %724 = vrot.lane.b32.xlu2 %v641_v5, %s1340_s13  ;;  %p1267_p3 = pnand %p1266_p0, %p1262_p10 }
 0x167   : > { %1270 = shalt.err (!%p1267_p3)
}
 0x168   : > { %s1341_s24 = smov 64   ;;  %s1342_s8 = smov 4  }
 0x169   : > { %1061 = dma.vmem_to_hbm [thread:$0]  (%p1481_p7), %s776_s26, 128, %s778_s10, %s743_s16, %s1341_s24, %s1341_s24, %s1342_s8  }
 0x16c   : > { %733 = vrot.lane.b32.xlu0 %v677_v13, %s1340_s13  ;;  %726 = vrot.lane.b32.xlu1 %v642_v15, %s1340_s13 }
 0x16d   : > { %715 = vrot.lane.b32.xlu2 %v677_v13, %s1339_s19 }
 0x175   : > { %688 = vrot.lane.b32.xlu2 %v642_v15, %s1338_s23 }
 0x17d   : > { %708 = vrot.lane.b32.xlu2 %v642_v15, %s1339_s19 }
 0x185   : > { %735 = vrot.lane.b32.xlu2 %v678_v18, %s1340_s13 }
 0x1af   : > { %v687_v19 = vpop.permute.xlu2 %686 }
 0x1b0   : > { %1024 = vst.msk [vmem:[%s1558_s3 + $0x8] sm:$0xf] %vm679_vm9, %v687_v19 }
 0x1b7   : > { %v707_v20 = vpop.permute.xlu2 %706 }
 0x1b8   : > { %1028 = vst.msk [vmem:[%s1558_s3 + $0x10] sm:$0xf] %vm679_vm9, %v707_v20 }
 0x1bf   : > { %v725_v21 = vpop.permute.xlu2 %724 }
 0x1c0   : > { %1032 = vst.msk [vmem:[%s1558_s3 + $0x18] sm:$0xf] %vm679_vm9, %v725_v21 }
 0x1c7   : > { %v716_v22 = vpop.permute.xlu2 %715 }
 0x1c8   : > { %1030 = vst.msk [vmem:[%s1570_s12 + $0x10] sm:$0xf] %vm679_vm9, %v716_v22 }
 0x1ce   : > { %v698_v23 = vpop.permute.xlu0 %697 }
 0x1cf   : > { %1026 = vst.msk [vmem:[%s1570_s12 + $0x8] sm:$0xf] %vm679_vm9, %v698_v23  ;;  %v689_v24 = vpop.permute.xlu2 %688 }
 0x1d0   : > { %1025 = vst.msk [vmem:[%s1558_s3 + $0xc] sm:$0xf] %vm679_vm9, %v689_v24 }
 0x1d6   : > { %v700_v25 = vpop.permute.xlu1 %699  ;;  %v718_v26 = vpop.permute.xlu0 %717 }
 0x1d7   : > { %1027 = vst.msk [vmem:[%s1570_s12 + $0xc] sm:$0xf] %vm679_vm9, %v700_v25  ;;  %v709_v27 = vpop.permute.xlu2 %708 }
 0x1d8   : > { %1031 = vst.msk [vmem:[%s1570_s12 + $0x14] sm:$0xf] %vm679_vm9, %v718_v26 }
 0x1d9   : > { %1029 = vst.msk [vmem:[%s1558_s3 + $0x14] sm:$0xf] %vm679_vm9, %v709_v27 }
 0x1de   : > { %v734_v28 = vpop.permute.xlu0 %733  ;;  %v727_v29 = vpop.permute.xlu1 %726 }
 0x1df   : > { %1034 = vst.msk [vmem:[%s1570_s12 + $0x18] sm:$0xf] %vm679_vm9, %v734_v28  ;;  %v736_v30 = vpop.permute.xlu2 %735 }
 0x1e0   : > { %1033 = vst.msk [vmem:[%s1558_s3 + $0x1c] sm:$0xf] %vm679_vm9, %v727_v29 }
 0x1e1   : > { %1035 = vst.msk [vmem:[%s1570_s12 + $0x1c] sm:$0xf] %vm679_vm9, %v736_v30 }
 0x1e2 PF: > { %s1685_s23 = sld [smem:[#allocation12_spill]]  ;;  %p1075_p5 = pnand %p983_p11, %p1447_p6 }
 0x1e4   : > { %p1076_p7 = pneg %p1075_p5 }
 0x1e8   : > { %s800_s26 = sand.u32 1, %s1685_s23  }
 0x1e9   : > { %s801_s30 = scalar_lea.sflag [#allocation4], %s800_s26 }
 0x1ea   : > { %1304 = dma.done.wait (%p1076_p7), %s801_s30, 128  }
 0x1eb   : > { %1306 = vsyncadd (%p1076_p7), %s801_s30, 4294967168  ;;  %s28_s18 = sadd.s32 1, %s1329_s18   ;;  %s1687_s3 = sld [smem:[#allocation14_spill]] }
 0x1ec   : > { %p25_p9 = scmp.ge.s32.totalorder %s28_s18, 4   ;;  %s1688_s13 = smov %s1313_s14 }
 0x1ed   : > { %s1689_s14 = smov %s1317_s15  ;;  %s1690_s15 = smov %s1490_s25 }
 0x1ee   : > { %s1691_s16 = smov %s1325_s17  ;;  %27 = sbr.rel (!%p25_p9) target bundleno = 12 (0xc), region = 138 }
 0x1f1   : > { %s1692_s17 = smov %s1687_s3 }
 0x1f3   :  { %831 = vsyncpa [#allocation3], 1 }
 0x1f4   :  { %833 = vsyncpa [#allocation3 + $0x1], 1 }
 0x1f5   :  { %834 = vsyncpa [#allocation6], 1 }
 0x1f6   :  { %835 = vsyncpa [#allocation4], 1 }
 0x1f7   :  { %837 = vsyncpa [#allocation4 + $0x1], 1 }

</bundles_post_ra>
